<compile_context>
chip_gen: v7x
topology: tpu7x:2x2x1
jax: 0.10.0
libtpu: 0.0.40
codegen_flags: <defaults>
</compile_context>

<pallas_src>
import functools
import math

import jax
import jax.numpy as jnp
from jax.experimental import pallas as pl
from jax.experimental.pallas import tpu as pltpu

# Fits the scoped-VMEM budget on every generation (v5e default 16 MiB / 128 MiB
# physical, v6e 32/128, v7x 32/64); tiles below stay well under this.
VMEM_LIMIT_BYTES = 32 * 1024 * 1024


# ----------------------------- helpers -----------------------------

def _tile_and_pad(dim, target, align):
    """Return (tile, padded_dim).

    dim <= target          -> full-dim block (always legal).
    dim  > target          -> largest `align`-multiple <= target dividing dim,
                              else pad dim up to a multiple of the target tile
                              (never silently return a full-array VMEM block).
    """
    if dim <= target:
        return dim, dim
    base = max((target // align) * align, align)
    t = base
    while t >= align:
        if dim % t == 0:
            return t, dim
        t -= align
    return base, ((dim + base - 1) // base) * base


# ----------------------------- matmul kernel -----------------------------

def _matmul_kernel(x_ref, w_ref, b_ref, *rest, epilogue, eps):
    """Tiled matmul with fused epilogue.

    epilogue == None          : y = x @ w + b
    epilogue == "gelu"        : y = gelu(x @ w + b)
    epilogue == "residual_ln" : y = LayerNorm(x @ w + b + residual) * g + beta
    """
    if epilogue == "residual_ln":
        res_ref, g_ref, beta_ref, o_ref, acc_ref = rest
    else:
        o_ref, acc_ref = rest

    @pl.when(pl.program_id(2) == 0)
    def _():
        acc_ref[...] = jnp.zeros_like(acc_ref)

    # Inputs are already bf16; f32 accumulation on the MXU.
    acc_ref[...] += jnp.dot(x_ref[...], w_ref[...],
                            preferred_element_type=jnp.float32)

    @pl.when(pl.program_id(2) == pl.num_programs(2) - 1)
    def _():
        y = acc_ref[...] + b_ref[...]                     # f32 epilogue math
        if epilogue == "gelu":
            # TODO(synk): torch/HF BERT uses exact erf GELU; tanh approximation
            # kept for a clean Mosaic lowering on all TPU generations.
            y = jax.nn.gelu(y, approximate=True)
        elif epilogue == "residual_ln":
            y = y + res_ref[...].astype(jnp.float32)
            mean = jnp.mean(y, axis=-1, keepdims=True)
            var = jnp.mean((y - mean) ** 2, axis=-1, keepdims=True)
            y = (y - mean) * jax.lax.rsqrt(var + eps) * g_ref[...] + beta_ref[...]
        o_ref[...] = y.astype(o_ref.dtype)


def linear(x, w, b, *, epilogue=None, residual=None, gamma=None, beta=None,
           out_dtype=jnp.bfloat16, tm=512, tn=512, tk=512, eps=1e-12):
    """x: [M,K] bf16, w: [K,N] bf16 (torch-transposed), b: [N] f32."""
    M, K = x.shape
    N = w.shape[1]
    x = x.astype(jnp.bfloat16)          # no-op in this model (activations are bf16)
    w = w.astype(jnp.bfloat16)
    b2 = b.reshape(1, N).astype(jnp.float32)

    if epilogue == "residual_ln":
        tn_, Np = N, N                  # LayerNorm reduces over the full feature dim
    else:
        tn_, Np = _tile_and_pad(N, tn, 128)
    tm_, Mp = _tile_and_pad(M, tm, 16)
    tk_, Kp = _tile_and_pad(K, tk, 128)

    if (Mp, Kp) != (M, K):
        x = jnp.pad(x, ((0, Mp - M), (0, Kp - K)))
    if (Kp, Np) != (K, N):
        w = jnp.pad(w, ((0, Kp - K), (0, Np - N)))
    if Np != N:
        b2 = jnp.pad(b2, ((0, 0), (0, Np - N)))

    grid = (Mp // tm_, Np // tn_, Kp // tk_)

    in_specs = [
        pl.BlockSpec((tm_, tk_), lambda i, j, k: (i, k)),
        pl.BlockSpec((tk_, tn_), lambda i, j, k: (k, j)),
        pl.BlockSpec((1, tn_), lambda i, j, k: (0, j)),
    ]
    args = [x, w, b2]
    if epilogue == "residual_ln":
        residual = residual.astype(jnp.bfloat16)
        if Mp != M:
            residual = jnp.pad(residual, ((0, Mp - M), (0, 0)))
        in_specs += [
            pl.BlockSpec((tm_, tn_), lambda i, j, k: (i, j)),
            pl.BlockSpec((1, tn_), lambda i, j, k: (0, j)),
            pl.BlockSpec((1, tn_), lambda i, j, k: (0, j)),
        ]
        args += [residual, gamma.reshape(1, N).astype(jnp.float32),
                 beta.reshape(1, N).astype(jnp.float32)]

    out_bytes = jnp.dtype(out_dtype).itemsize
    cost = pl.CostEstimate(
        flops=2 * Mp * Kp * Np,
        transcendentals=Mp * Np if epilogue == "gelu" else 0,
        bytes_accessed=(Mp * Kp * 2 + Kp * Np * 2 + Mp * Np * out_bytes
                        + (Mp * Np * 2 if epilogue == "residual_ln" else 0)),
    )

    out = pl.pallas_call(
        functools.partial(_matmul_kernel, epilogue=epilogue, eps=eps),
        out_shape=jax.ShapeDtypeStruct((Mp, Np), out_dtype),
        grid=grid,
        in_specs=in_specs,
        out_specs=pl.BlockSpec((tm_, tn_), lambda i, j, k: (i, j)),
        scratch_shapes=[pltpu.VMEM((tm_, tn_), jnp.float32)],
        compiler_params=pltpu.CompilerParams(
            dimension_semantics=("parallel", "parallel", "arbitrary"),
            vmem_limit_bytes=VMEM_LIMIT_BYTES),
        cost_estimate=cost,
    )(*args)

    if (Mp, Np) != (M, N):
        out = out[:M, :N]
    return out


# ----------------------------- LayerNorm kernel (embeddings only) -----------------------------

def _layernorm_kernel(x_ref, g_ref, b_ref, o_ref, *, eps):
    x = x_ref[...].astype(jnp.float32)
    mean = jnp.mean(x, axis=-1, keepdims=True)
    var = jnp.mean((x - mean) ** 2, axis=-1, keepdims=True)
    o_ref[...] = ((x - mean) * jax.lax.rsqrt(var + eps) * g_ref[...]
                  + b_ref[...]).astype(o_ref.dtype)


def layernorm(x, g, b, *, eps=1e-12, tm=512, out_dtype=jnp.bfloat16):
    """Standalone LN (embedding output). x: [M,H] f32, g/b: [1,H] f32 -> bf16."""
    M, H = x.shape
    tm_, Mp = _tile_and_pad(M, tm, 8)
    if Mp != M:
        x = jnp.pad(x, ((0, Mp - M), (0, 0)))
    out = pl.pallas_call(
        functools.partial(_layernorm_kernel, eps=eps),
        out_shape=jax.ShapeDtypeStruct((Mp, H), out_dtype),
        grid=(Mp // tm_,),
        in_specs=[
            pl.BlockSpec((tm_, H), lambda i: (i, 0)),
            pl.BlockSpec((1, H), lambda i: (0, 0)),
            pl.BlockSpec((1, H), lambda i: (0, 0)),
        ],
        out_specs=pl.BlockSpec((tm_, H), lambda i: (i, 0)),
        compiler_params=pltpu.CompilerParams(
            dimension_semantics=("parallel",),
            vmem_limit_bytes=VMEM_LIMIT_BYTES),
    )(x, g, b)
    return out[:M] if Mp != M else out


# ----------------------------- attention kernel -----------------------------

def _attention_kernel(q_ref, kv_ref, m_ref, o_ref, *, n_heads, head_dim, scale):
    """One (batch, q-tile) grid step. Heads split in-VMEM, per-head (tq, S) scores,
    output written as a lane-dense (tq, H) slab (heads concatenated in VMEM)."""
    H = n_heads * head_dim
    q_all = q_ref[0]                 # (tq, 3H) bf16 -- query rows of this tile
    kv_all = kv_ref[0]               # (S, 3H)  bf16 -- full sequence (keys/values)
    mbias = m_ref[0]                 # (1, S)   f32 additive key mask

    ctx = []
    for h in range(n_heads):         # static unroll; per-head working set only
        q = q_all[:, h * head_dim:(h + 1) * head_dim] * scale       # scale folded into q (bf16)
        k = kv_all[:, H + h * head_dim: H + (h + 1) * head_dim]
        v = kv_all[:, 2 * H + h * head_dim: 2 * H + (h + 1) * head_dim]
        s = jax.lax.dot_general(q, k, (((1,), (1,)), ((), ())),     # q @ k^T without k.T
                                preferred_element_type=jnp.float32)  # (tq, S) f32
        s = s + mbias
        s = s - jnp.max(s, axis=-1, keepdims=True)                   # f32 softmax stats
        p = jnp.exp(s)
        p = p * pl.reciprocal(jnp.sum(p, axis=-1, keepdims=True), approx=True)
        ctx.append(jnp.dot(p.astype(v.dtype), v,
                           preferred_element_type=jnp.float32))      # (tq, Dh) f32
    o_ref[0] = jnp.concatenate(ctx, axis=-1).astype(o_ref.dtype)     # lane-dense (tq, H)


def attention(qkv, mask_bias, *, n_heads, tq=256):
    """qkv: [B, S, 3H] bf16 (fused QKV, heads interleaved per projection);
    mask_bias: [B, 1, S] f32 (0 keep, -10000 masked). Returns [B, S, H] bf16."""
    B, S, threeH = qkv.shape
    H = threeH // 3
    Dh = H // n_heads
    scale = 1.0 / math.sqrt(Dh)

    tq_, Sp = _tile_and_pad(S, tq, 8)
    if Sp != S:          # awkward S: single full-length q tile (keys need full S anyway)
        tq_ = S
    nq = S // tq_

    return pl.pallas_call(
        functools.partial(_attention_kernel, n_heads=n_heads, head_dim=Dh, scale=scale),
        out_shape=jax.ShapeDtypeStruct((B, S, H), jnp.bfloat16),
        grid=(B, nq),
        in_specs=[
            pl.BlockSpec((1, tq_, threeH), lambda b, q: (b, q, 0)),  # query rows
            pl.BlockSpec((1, S, threeH), lambda b, q: (b, 0, 0)),    # keys/values (resident over q)
            pl.BlockSpec((1, 1, S), lambda b, q: (b, 0, 0)),         # mask (once per batch)
        ],
        out_specs=pl.BlockSpec((1, tq_, H), lambda b, q: (b, q, 0)),
        compiler_params=pltpu.CompilerParams(
            dimension_semantics=("parallel", "parallel"),
            vmem_limit_bytes=VMEM_LIMIT_BYTES),
    )(qkv, qkv, mask_bias)


# ----------------------------- Model (glue in JAX) -----------------------------

def init_params(key, *, vocab, H, n_layers, inter, max_pos, n_type):
    ks = iter(jax.random.split(key, 8 + 8 * n_layers))

    def w(shape, scale=0.02, dtype=jnp.bfloat16):
        return (jax.random.normal(next(ks), shape, jnp.float32) * scale).astype(dtype)

    params = {
        "word_emb": w((vocab, H), dtype=jnp.float32),
        "pos_emb": w((max_pos, H), dtype=jnp.float32),
        "type_emb": w((n_type, H), dtype=jnp.float32),
        "emb_ln_g": jnp.ones((1, H), jnp.float32),
        "emb_ln_b": jnp.zeros((1, H), jnp.float32),
        "layers": [],
    }
    for _ in range(n_layers):
        params["layers"].append({
            # Fused Q|K|V projection weight: [H, 3H] (bf16), bias [3H] (f32).
            "wqkv": w((H, 3 * H)), "bqkv": jnp.zeros((3 * H,), jnp.float32),
            "wo": w((H, H)), "bo": jnp.zeros((H,), jnp.float32),
            "ln1_g": jnp.ones((1, H), jnp.float32),
            "ln1_b": jnp.zeros((1, H), jnp.float32),
            "w1": w((H, inter)), "b1": jnp.zeros((inter,), jnp.float32),
            "w2": w((inter, H)), "b2": jnp.zeros((H,), jnp.float32),
            "ln2_g": jnp.ones((1, H), jnp.float32),
            "ln2_b": jnp.zeros((1, H), jnp.float32),
        })
    # predictword: nn.Linear(hidden_size, n_class)  (n_class == vocab_size)
    params["w_pred"] = w((H, vocab))
    params["b_pred"] = jnp.zeros((vocab,), jnp.float32)
    return params


def bert_classifier_forward(params, X, *, n_heads):
    """Mirrors BertClassifier.forward: X = (input_ids, attention_mask, token_type_ids)."""
    input_ids, attention_mask, token_type_ids = X[0], X[1], X[2]
    B, S = input_ids.shape
    H = params["emb_ln_g"].shape[1]

    # Embeddings (gathers are XLA glue; LayerNorm is a Pallas kernel, bf16 out).
    emb = (jnp.take(params["word_emb"], input_ids, axis=0)
           + params["pos_emb"][:S][None, :, :]
           + jnp.take(params["type_emb"], token_type_ids, axis=0))
    h = layernorm(emb.reshape(B * S, H), params["emb_ln_g"], params["emb_ln_b"])  # bf16 [M,H]

    # HF-style extended attention mask: 0 for kept tokens, -10000 for masked (f32).
    mask_bias = ((1.0 - attention_mask.astype(jnp.float32)) * -10000.0).reshape(B, 1, S)

    for layer in params["layers"]:
        # Fused QKV projection: one matmul, lane-dense [M, 3H] bf16 output.
        qkv = linear(h, layer["wqkv"], layer["bqkv"], out_dtype=jnp.bfloat16)
        # Free reshape only (no XLA transpose); heads are split inside the kernel.
        ctx = attention(qkv.reshape(B, S, 3 * H), mask_bias, n_heads=n_heads)  # [B,S,H] bf16
        ctx = ctx.reshape(B * S, H)                                            # free reshape

        # Output projection with fused bias + residual + LayerNorm epilogue (bf16 out).
        h = linear(ctx, layer["wo"], layer["bo"], epilogue="residual_ln",
                   residual=h, gamma=layer["ln1_g"], beta=layer["ln1_b"],
                   out_dtype=jnp.bfloat16)

        # FFN: matmul + fused GELU, then matmul + fused bias/residual/LayerNorm.
        ff = linear(h, layer["w1"], layer["b1"], epilogue="gelu",
                    out_dtype=jnp.bfloat16)
        h = linear(ff, layer["w2"], layer["b2"], epilogue="residual_ln",
                   residual=h, gamma=layer["ln2_g"], beta=layer["ln2_b"],
                   out_dtype=jnp.bfloat16)

    last_hidden_state = h  # bf16 [B*S, H]

    # TODO(synk): nn.Dropout(0.5) is stochastic in train mode; implemented as
    # eval-mode identity for deterministic forward semantics.
    logits = linear(last_hidden_state, params["w_pred"], params["b_pred"],
                    out_dtype=jnp.float32)
    n_class = params["w_pred"].shape[1]
    return logits.reshape(B, S, n_class)


# ----------------------------- Demo -----------------------------

if __name__ == "__main__":
    B, S = 2, 8
    H, n_heads = 32, 4
    inter = 64
    vocab = 128          # n_class == tokenizer.vocab_size
    n_layers = 2
    max_pos, n_type = 16, 2

    key = jax.random.PRNGKey(0)
    k_ids, k_params = jax.random.split(key, 2)

    input_ids = jax.random.randint(k_ids, (B, S), 0, vocab, dtype=jnp.int32)
    attention_mask = jnp.ones((B, S), jnp.int32).at[1, 6:].set(0)
    token_type_ids = jnp.zeros((B, S), jnp.int32).at[:, 4:].set(1)

    params = init_params(k_params, vocab=vocab, H=H, n_layers=n_layers,
                         inter=inter, max_pos=max_pos, n_type=n_type)

    logits = bert_classifier_forward(
        params, (input_ids, attention_mask, token_type_ids), n_heads=n_heads)
    jax.block_until_ready(logits)

    assert logits.shape == (B, S, vocab), logits.shape
    assert logits.dtype == jnp.float32
    assert bool(jnp.all(jnp.isfinite(logits)))
    print("KERNEL_OK")
</pallas_src>

<mosaic_0001>
module attributes {stable_mosaic.version = 11 : i64} {
  func.func @_layernorm_kernel(%arg0: i32, %arg1: memref<16x32xf32, #tpu.memory_space<vmem>>, %arg2: memref<1x32xf32, #tpu.memory_space<vmem>>, %arg3: memref<1x32xf32, #tpu.memory_space<vmem>>, %arg4: memref<16x32xbf16, #tpu.memory_space<vmem>>) attributes {dimension_semantics = [#tpu.dimension_semantics<parallel>], iteration_bounds = array<i64: 1>, scalar_prefetch = 0 : i64, scratch_operands = 0 : i64, tpu.core_type = #tpu.core_type<tc>, window_params = [{transform_indices = @transform_0, window_bounds = array<i64: 16, 32>}, {pipeline_mode = #tpu.pipeline_mode<synchronous>, transform_indices = @transform_1, window_bounds = array<i64: 1, 32>}, {pipeline_mode = #tpu.pipeline_mode<synchronous>, transform_indices = @transform_2, window_bounds = array<i64: 1, 32>}, {transform_indices = @transform_3, window_bounds = array<i64: 16, 32>}]} {
    %c0 = arith.constant 0 : index
    %c0_0 = arith.constant 0 : index
    %0 = vector.load %arg1[%c0, %c0_0] : memref<16x32xf32, #tpu.memory_space<vmem>>, vector<16x32xf32>
    %cst = arith.constant dense<0.000000e+00> : vector<16xf32>
    %1 = vector.multi_reduction <add>, %0, %cst [1] : vector<16x32xf32> to vector<16xf32>
    %2 = vector.shape_cast %1 : vector<16xf32> to vector<16x1xf32>
    %cst_1 = arith.constant 3.200000e+01 : f32
    %3 = vector.broadcast %cst_1 : f32 to vector<16x1xf32>
    %4 = arith.divf %2, %3 : vector<16x1xf32>
    %5 = vector.broadcast %4 : vector<16x1xf32> to vector<16x32xf32>
    %6 = arith.subf %0, %5 : vector<16x32xf32>
    %7 = arith.mulf %6, %6 : vector<16x32xf32>
    %cst_2 = arith.constant dense<0.000000e+00> : vector<16xf32>
    %8 = vector.multi_reduction <add>, %7, %cst_2 [1] : vector<16x32xf32> to vector<16xf32>
    %9 = vector.shape_cast %8 : vector<16xf32> to vector<16x1xf32>
    %cst_3 = arith.constant 3.200000e+01 : f32
    %10 = vector.broadcast %cst_3 : f32 to vector<16x1xf32>
    %11 = arith.divf %9, %10 : vector<16x1xf32>
    %12 = vector.broadcast %4 : vector<16x1xf32> to vector<16x32xf32>
    %13 = arith.subf %0, %12 : vector<16x32xf32>
    %cst_4 = arith.constant 9.99999996E-13 : f32
    %14 = vector.broadcast %cst_4 : f32 to vector<16x1xf32>
    %15 = arith.addf %11, %14 : vector<16x1xf32>
    %16 = math.rsqrt %15 : vector<16x1xf32>
    %17 = vector.broadcast %16 : vector<16x1xf32> to vector<16x32xf32>
    %18 = arith.mulf %13, %17 : vector<16x32xf32>
    %c0_5 = arith.constant 0 : index
    %c0_6 = arith.constant 0 : index
    %19 = vector.load %arg2[%c0_5, %c0_6] : memref<1x32xf32, #tpu.memory_space<vmem>>, vector<1x32xf32>
    %20 = vector.broadcast %19 : vector<1x32xf32> to vector<16x32xf32>
    %21 = arith.mulf %18, %20 : vector<16x32xf32>
    %c0_7 = arith.constant 0 : index
    %c0_8 = arith.constant 0 : index
    %22 = vector.load %arg3[%c0_7, %c0_8] : memref<1x32xf32, #tpu.memory_space<vmem>>, vector<1x32xf32>
    %23 = vector.broadcast %22 : vector<1x32xf32> to vector<16x32xf32>
    %24 = arith.addf %21, %23 : vector<16x32xf32>
    %25 = arith.truncf %24 : vector<16x32xf32> to vector<16x32xbf16>
    %c0_9 = arith.constant 0 : index
    %c0_10 = arith.constant 0 : index
    %26 = vector.load %arg4[%c0_9, %c0_10] : memref<16x32xbf16, #tpu.memory_space<vmem>>, vector<16x32xbf16>
    tpu.vector_store %arg4[%c0_9, %c0_10], %25 {strides = array<i32>} : memref<16x32xbf16, #tpu.memory_space<vmem>>, vector<16x32xbf16>,
    return
  }
  func.func @transform_0(%arg0: i32) -> (i32, i32) {
    %c0_i32 = arith.constant 0 : i32
    %c0_i32_0 = arith.constant 0 : i32
    return %arg0, %c0_i32 : i32, i32
  }
  func.func @transform_1(%arg0: i32) -> (i32, i32) {
    %c0_i32 = arith.constant 0 : i32
    %c0_i32_0 = arith.constant 0 : i32
    %c0_i32_1 = arith.constant 0 : i32
    return %c0_i32, %c0_i32_0 : i32, i32
  }
  func.func @transform_2(%arg0: i32) -> (i32, i32) {
    %c0_i32 = arith.constant 0 : i32
    %c0_i32_0 = arith.constant 0 : i32
    %c0_i32_1 = arith.constant 0 : i32
    return %c0_i32, %c0_i32_0 : i32, i32
  }
  func.func @transform_3(%arg0: i32) -> (i32, i32) {
    %c0_i32 = arith.constant 0 : i32
    %c0_i32_0 = arith.constant 0 : i32
    return %arg0, %c0_i32 : i32, i32
  }
}

</mosaic_0001>

<bundles_post_ra>
// kernel: tpu_custom_call.1
= control target key start
LH: loop header
LB: loop body
LE: loop exit
PB: predicated region body
PF: predicated region fallthrough
CT: control target
= control target key end

     0   :  { %8 = vsyncpa [#allocation3], 0  ;;  %s229_s0 = inlined_call_operand.hbm [shape: f32[16,32], index: 0, kind: input, shape index: {}]   ;;  %s230_s1 = inlined_call_operand.vmem [shape: f32[1,32], index: 1, kind: input, shape index: {}]   ;;  %s231_s2 = inlined_call_operand.vmem [shape: f32[1,32], index: 2, kind: input, shape index: {}]   ;;  %s232_s3 = inlined_call_operand.hbm [shape: bf16[16,32], index: 3, kind: output, shape index: {}]  }
   0x1   :  { %9 = vsyncpa [#allocation4], 0  ;;  %s169_s12 = smov [#allocation2]   ;;  %s121_s16 = scalar_lea.hbm %s229_s0, 256 }
   0x2   :  { %s15_s13 = sshll.u32 %s169_s12, 4  ;;  %p122_p0 = scmp.ne.s32.totalorder %s229_s0, %s121_s16  ;;  %s16_s13 = int_to_ptr.vmem [resolvable:$true] %s15_s13 }
   0x3   :  { %p125_p1 = scmp.lt.u32.totalorder %s121_s16, %s229_s0 }
   0x5   :  { %p127_p2 = pnand %p125_p1, %p122_p0 }
   0x7   :  { %130 = shalt.err (!%p127_p2)
}
   0x8   :  { %s131_s21 = scalar_lea.vmem %s16_s13, 256  ;;  %p136_p4 = scmp.lt.s32.totalorder %s16_s13, %s16_s13 }
   0x9   :  { %p132_p3 = scmp.ne.s32.totalorder %s16_s13, %s131_s21  ;;  %p137_p5 = scmp.lt.s32.totalorder %s131_s21, %s131_s21 }
   0xb   :  { %p138_p6 = por %p137_p5, %p136_p4 }
   0xd   :  { %p139_p7 = pnand %p138_p6, %p132_p3 }
   0xf   :  { %142 = shalt.err (!%p139_p7)
}
  0x10   :  { %s170_s22 = smov 128   ;;  %s171_s23 = smov 8  }
  0x11   :  { %21 = dma.hbm_to_vmem [thread:$0]  %s229_s0, 256, %s16_s13, [#allocation3], %s170_s22, %s170_s22, %s171_s23  }
  0x12   :  { %165 = dma.done.wait [#allocation3], 256  }
  0x13   :  { %166 = vsyncadd [#allocation3], 4294967040  ;;  %vm31_vm0 = vcmask 261120   ;;  %v29_v0 = vld [vmem:[#allocation2] sm:$0xff]  ;;  %v30_v1 = vld [vmem:[#allocation2 + $0x8] sm:$0xff]  ;;  %vm85_vm1 = vcmask 257024  }
  0x14   :  { %v32_v2 = vsel %vm31_vm0, %v29_v0, 0.0  ;;  %v35_v3 = vsel %vm31_vm0, %v30_v1, 0.0  ;;  %v105_v21 = vld [vmem:[%s230_s1] ss:$0 sm:$0xff]  ;;  %s172_s29 = smov [#allocation5]  }
  0x15   :  { %33 = vadd.xlane.f32.xlu0 %v32_v2  ;;  %v106_v23 = vld [vmem:[%s231_s2] ss:$0 sm:$0xff]  ;;  %s93_s30 = sshll.u32 %s172_s29, 4  ;;  %s94_s30 = int_to_ptr.vmem [resolvable:$true] %s93_s30 }
  0x16   :  { %s143_s1 = scalar_lea.vmem %s94_s30, 128  ;;  %p148_p9 = scmp.lt.s32.totalorder %s94_s30, %s94_s30 }
  0x17   :  { %p144_p8 = scmp.ne.s32.totalorder %s94_s30, %s143_s1  ;;  %p149_p10 = scmp.lt.s32.totalorder %s143_s1, %s143_s1 }
  0x19   :  { %36 = vadd.xlane.f32.xlu0 %v35_v3  ;;  %p150_p11 = por %p149_p10, %p148_p9 }
  0x1b   :  { %p151_p12 = pnand %p150_p11, %p144_p8 }
  0xa2   :  { %v34_v4 = vpop.xlane.xlu0 %33 }
  0xa3   :  { %v39_v5 = vmul.f32 0.03125, %v34_v4 }
  0xa5   :  { %v41_v6 = vsub.f32 %v29_v0, %v39_v5 }
  0xa6   :  { %v37_v7 = vpop.xlane.xlu0 %36 }
  0xa7   :  { %v40_v8 = vmul.f32 0.03125, %v37_v7  ;;  %v43_v9 = vmul.f32 %v41_v6, %v41_v6 }
  0xa9   :  { %v42_v10 = vsub.f32 %v30_v1, %v40_v8  ;;  %v45_v11 = vsel %vm31_vm0, %v43_v9, 0.0 }
  0xaa   :  { %46 = vadd.xlane.f32.xlu1 %v45_v11 }
  0xab   :  { %v44_v12 = vmul.f32 %v42_v10, %v42_v10 }
  0xad   :  { %v48_v13 = vsel %vm31_vm0, %v44_v12, 0.0 }
  0xae   :  { %49 = vadd.xlane.f32.xlu1 %v48_v13 }
 0x137   :  { %v47_v14 = vpop.xlane.xlu1 %46 }
 0x138   :  { %v51_v15 = vmul.f32 0.03125, %v47_v14 }
 0x13a   :  { %v53_v16 = vadd.f32 1e-12, %v51_v15 }
 0x13b   :  { %v50_v17 = vpop.xlane.xlu1 %49 }
 0x13c   :  { %117 = vrsqrt.f32 %v53_v16  ;;  %v52_v18 = vmul.f32 0.03125, %v50_v17 }
 0x13e   :  { %v54_v19 = vadd.f32 1e-12, %v52_v18 }
 0x140   :  { %119 = vrsqrt.f32 %v54_v19 }
 0x146   :  { %v118_v20 = vpop.eup %117 }
 0x147   :  { %v57_v22 = vmul.f32 %v118_v20, %v41_v6 }
 0x149   :  { %v66_v24 = vmul.f32 %v105_v21, %v57_v22 }
 0x14a   :  { %v120_v25 = vpop.eup %119 }
 0x14b   :  { %v58_v26 = vmul.f32 %v120_v25, %v42_v10  ;;  %v75_v27 = vadd.f32 %v106_v23, %v66_v24 }
 0x14d   :  { %v67_v28 = vmul.f32 %v105_v21, %v58_v26  ;;  %v109_v29 = vpack.c.bf16 %v75_v27, %v75_v27 }
 0x14f   :  { %v76_v30 = vadd.f32 %v106_v23, %v67_v28  ;;  %86 = vst.msk [vmem:[#allocation5] sm:$0xf] %vm85_vm1, %v109_v29 }
 0x151   :  { %v110_v31 = vpack.c.bf16 %v76_v30, %v76_v30 }
 0x153   :  { %87 = vst.msk [vmem:[#allocation5 + $0x4] sm:$0xf] %vm85_vm1, %v110_v31 }
 0x154   :  { %154 = shalt.err (!%p151_p12)
}
 0x155   :  { %s155_s5 = scalar_lea.hbm %s232_s3, 128 }
 0x156   :  { %p156_p13 = scmp.ne.s32.totalorder %s232_s3, %s155_s5  ;;  %p159_p0 = scmp.lt.u32.totalorder %s155_s5, %s232_s3 }
 0x158   :  { %p161_p1 = pnand %p159_p0, %p156_p13 }
 0x15a   :  { %164 = shalt.err (!%p161_p1)
}
 0x15b   :  { %s173_s10 = smov 64   ;;  %s174_s11 = smov 4  }
 0x15c   :  { %99 = dma.vmem_to_hbm [thread:$0]  %s94_s30, 128, %s232_s3, [#allocation4], %s173_s10, %s173_s10, %s174_s11  }
 0x15d   :  { %167 = dma.done.wait [#allocation4], 128  }
 0x15e   :  { %168 = vsyncadd [#allocation4], 4294967168 }
 0x15f   :  { %103 = vsyncpa [#allocation3], 1 }
 0x160   :  { %104 = vsyncpa [#allocation4], 1 }

</bundles_post_ra>
